<compile_context>
chip_gen: v7x
topology: tpu7x:2x2x1
jax: 0.10.0
libtpu: 0.0.40
codegen_flags: <defaults>
</compile_context>

<pallas_src>
import jax
import jax.numpy as jnp
from jax.experimental import pallas as pl
from jax.experimental.pallas import tpu as pltpu

EPS = 1e-5
FPAD = 128  # lane-dense width used for every feature dimension


def _bn_relu(h, gamma, beta):
    # Training-mode BatchNorm1d folded into one scale/shift, then ReLU.
    # h: (B, F) f32; gamma/beta: (1, F) f32.  Single-pass variance.
    mean = jnp.mean(h, axis=0, keepdims=True)
    var = jnp.maximum(jnp.mean(h * h, axis=0, keepdims=True) - mean * mean, 0.0)
    scale = gamma * jax.lax.rsqrt(var + EPS)          # gamma / sqrt(var+eps)
    shift = beta - mean * scale
    return jnp.maximum(h * scale + shift, 0.0)


def batch_net_kernel(x_ref, w_ref, vec_ref, o_ref):
    # w_ref: bf16 (FPAD, 3*FPAD) slab:
    #   [:, 0:F]   = W1 (rows 0:in_dim live, rest zero; cols 0:h1d live)
    #   [:, F:2F]  = W2 (rows 0:h1d live)
    #   [:, 2F:3F] = W3 (rows 0:h2d live, cols 0:out_dim live)
    # vec_ref rows (f32, zero-padded): 0=gamma1 1=beta1 2=gamma2 3=beta2 4=b3
    F = FPAD
    in_dim = x_ref.shape[1]

    x = x_ref[...].astype(jnp.bfloat16)               # cast fused into the kernel

    # layer1: Linear (bias cancelled exactly by train-mode BN) + BN + ReLU.
    # Static ref slice keeps the contraction at K=in_dim (no x padding needed).
    h1 = jnp.dot(x, w_ref[0:in_dim, 0:F], preferred_element_type=jnp.float32)
    h1 = _bn_relu(h1, vec_ref[0:1, :], vec_ref[1:2, :])    # padded lanes stay 0

    # layer2: Linear + BN + ReLU (full 128-lane contraction; pad rows are 0).
    h2 = jnp.dot(h1.astype(jnp.bfloat16), w_ref[:, F:2 * F],
                 preferred_element_type=jnp.float32)
    h2 = _bn_relu(h2, vec_ref[2:3, :], vec_ref[3:4, :])

    # layer3: Linear + bias; output kept 128-lane dense (unmasked vst).
    o_ref[...] = jnp.dot(h2.astype(jnp.bfloat16), w_ref[:, 2 * F:3 * F],
                         preferred_element_type=jnp.float32) + vec_ref[4:5, :]


def pack_params(params):
    """One-time parameter packing. Call at init time, NOT per forward."""
    (w1, b1, g1, be1, w2, b2, g2, be2, w3, b3) = params
    del b1, b2  # exactly cancelled by training-mode BatchNorm mean subtraction
    in_dim, h1d = w1.shape
    h2d = w2.shape[1]
    out_dim = w3.shape[1]
    assert max(in_dim, h1d, h2d, out_dim) <= FPAD, "dims > 128 need a tiled variant"
    assert in_dim % 8 == 0, "in_dim must be a multiple of 8 (sublane) for the W1 slice"

    # Single bf16 weight slab, every block zero-padded to 128x128.
    wslab = jnp.zeros((FPAD, 3 * FPAD), jnp.bfloat16)
    wslab = wslab.at[:in_dim, 0:h1d].set(w1.astype(jnp.bfloat16))
    wslab = wslab.at[:h1d, FPAD:FPAD + h2d].set(w2.astype(jnp.bfloat16))
    wslab = wslab.at[:h2d, 2 * FPAD:2 * FPAD + out_dim].set(w3.astype(jnp.bfloat16))

    # Single f32 slab for all small per-feature vectors (pad lanes MUST be 0:
    # that invariant keeps the 128-lane BN exact for padded features).
    vecs = jnp.zeros((8, FPAD), jnp.float32)
    vecs = vecs.at[0, :h1d].set(g1.reshape(-1))
    vecs = vecs.at[1, :h1d].set(be1.reshape(-1))
    vecs = vecs.at[2, :h2d].set(g2.reshape(-1))
    vecs = vecs.at[3, :h2d].set(be2.reshape(-1))
    vecs = vecs.at[4, :out_dim].set(b3.reshape(-1))

    dims = {"in_dim": in_dim, "h1d": h1d, "h2d": h2d, "out_dim": out_dim}
    return wslab, vecs, dims


def batch_net_forward(x, packed):
    wslab, vecs, dims = packed
    B, in_dim = x.shape
    assert in_dim == dims["in_dim"]
    out_dim = dims["out_dim"]
    args = (x, wslab, vecs)

    def full_spec(a):
        # whole array resident in VMEM; no grid (train-mode BN needs full batch)
        return pl.BlockSpec(a.shape, lambda *_, n=a.ndim: (0,) * n)

    flops = 2 * B * (in_dim * FPAD + 2 * FPAD * FPAD) + 12 * B * 2 * FPAD
    bytes_accessed = sum(int(a.size) * a.dtype.itemsize for a in args) + B * FPAD * 4

    out = pl.pallas_call(
        batch_net_kernel,
        out_shape=jax.ShapeDtypeStruct((B, FPAD), jnp.float32),
        in_specs=[full_spec(a) for a in args],
        out_specs=pl.BlockSpec((B, FPAD), lambda *_: (0, 0)),
        cost_estimate=pl.CostEstimate(flops=flops,
                                      transcendentals=2 * FPAD,
                                      bytes_accessed=bytes_accessed),
        compiler_params=pltpu.CompilerParams(vmem_limit_bytes=32 * 1024 * 1024),
    )(*args)
    return out[:, :out_dim]


def init_params(key, in_dim, n_hidden_1, n_hidden_2, out_dim):
    ks = jax.random.split(key, 6)

    def linear(kw, kb, fan_in, fan_out):
        # PyTorch nn.Linear default init: U(-1/sqrt(fan_in), 1/sqrt(fan_in))
        bound = 1.0 / jnp.sqrt(fan_in)
        w = jax.random.uniform(kw, (fan_in, fan_out), jnp.float32, -bound, bound)
        b = jax.random.uniform(kb, (1, fan_out), jnp.float32, -bound, bound)
        return w, b

    w1, b1 = linear(ks[0], ks[1], in_dim, n_hidden_1)
    w2, b2 = linear(ks[2], ks[3], n_hidden_1, n_hidden_2)
    w3, b3 = linear(ks[4], ks[5], n_hidden_2, out_dim)

    # BatchNorm1d affine params: gamma=1, beta=0 (PyTorch default init)
    g1 = jnp.ones((1, n_hidden_1), jnp.float32)
    be1 = jnp.zeros((1, n_hidden_1), jnp.float32)
    g2 = jnp.ones((1, n_hidden_2), jnp.float32)
    be2 = jnp.zeros((1, n_hidden_2), jnp.float32)

    return (w1, b1, g1, be1, w2, b2, g2, be2, w3, b3)


def reference_forward_f32(x, params):
    # Exact PyTorch forward semantics in f32 (biases included, training-mode BN).
    (w1, b1, g1, be1, w2, b2, g2, be2, w3, b3) = params

    def bn_relu(h, g, be):
        m = jnp.mean(h, axis=0, keepdims=True)
        v = jnp.mean((h - m) ** 2, axis=0, keepdims=True)
        return jnp.maximum((h - m) / jnp.sqrt(v + EPS) * g + be, 0.0)

    h = bn_relu(x @ w1 + b1, g1, be1)
    h = bn_relu(h @ w2 + b2, g2, be2)
    return h @ w3 + b3


def reference_forward_bf16(x, params):
    # Mimics the kernel's numerics: bf16 matmul operands / f32 accumulation,
    # b1/b2 dropped (exactly cancelled by BN), same folded single-pass BN.
    (w1, _b1, g1, be1, w2, _b2, g2, be2, w3, b3) = params

    def dot_bf16(a, w):
        return jnp.dot(a.astype(jnp.bfloat16), w.astype(jnp.bfloat16),
                       preferred_element_type=jnp.float32)

    h1 = _bn_relu(dot_bf16(x, w1), g1, be1)
    h2 = _bn_relu(dot_bf16(h1, w2), g2, be2)
    return dot_bf16(h2, w3) + b3


if __name__ == "__main__":
    # small MLP shapes: batch=8, in=32, hidden1=64, hidden2=32, out=16
    B, in_dim, n_h1, n_h2, out_dim = 8, 32, 64, 32, 16

    key = jax.random.PRNGKey(0)
    kx, kp = jax.random.split(key)
    x = jax.random.normal(kx, (B, in_dim), jnp.float32)
    params = init_params(kp, in_dim, n_h1, n_h2, out_dim)

    packed = pack_params(params)          # one-time packing (hoisted out of fwd)
    out = jax.block_until_ready(batch_net_forward(x, packed))
    assert out.shape == (B, out_dim)

    # Tight check: kernel vs a JAX reference with identical dtype/formula flow.
    ref_tight = reference_forward_bf16(x, params)
    assert jnp.allclose(out, ref_tight, atol=2e-3, rtol=2e-3), \
        "mismatch vs bf16-mimicking reference"

    # Semantic check: vs exact f32 PyTorch-style forward (loose tolerance for
    # bf16 matmul operands).
    ref_f32 = reference_forward_f32(x, params)
    assert jnp.allclose(out, ref_f32, atol=8e-2, rtol=8e-2), \
        "mismatch vs f32 PyTorch-semantics reference"

    print("KERNEL_OK")
</pallas_src>

<mosaic_0001>
module attributes {stable_mosaic.version = 11 : i64} {
  func.func @batch_net_kernel(%arg0: memref<8x32xf32, #tpu.memory_space<vmem>>, %arg1: memref<128x384xbf16, #tpu.memory_space<vmem>>, %arg2: memref<8x128xf32, #tpu.memory_space<vmem>>, %arg3: memref<8x128xf32, #tpu.memory_space<vmem>>) attributes {dimension_semantics = [], scalar_prefetch = 0 : i64, scratch_operands = 0 : i64, tpu.core_type = #tpu.core_type<tc>} {
    %c0 = arith.constant 0 : index
    %c0_0 = arith.constant 0 : index
    %0 = vector.load %arg0[%c0, %c0_0] : memref<8x32xf32, #tpu.memory_space<vmem>>, vector<8x32xf32>
    %1 = arith.truncf %0 : vector<8x32xf32> to vector<8x32xbf16>
    %c0_1 = arith.constant 0 : index
    %c0_2 = arith.constant 0 : index
    %2 = vector.load %arg1[%c0_1, %c0_2] : memref<128x384xbf16, #tpu.memory_space<vmem>>, vector<32x128xbf16>
    %cst = arith.constant dense<0.000000e+00> : vector<8x128xf32>
    %3 = tpu.matmul %1, %2, %cst {dimension_numbers = #tpu.dot_dimension_numbers<[1], [0], [0], [1], [0, 0, 1, 1], [], []>} : vector<8x32xbf16>, vector<32x128xbf16>, vector<8x128xf32> -> vector<8x128xf32>
    %c0_3 = arith.constant 0 : index
    %c0_4 = arith.constant 0 : index
    %4 = vector.load %arg2[%c0_3, %c0_4] : memref<8x128xf32, #tpu.memory_space<vmem>>, vector<1x128xf32>
    %c1 = arith.constant 1 : index
    %c0_5 = arith.constant 0 : index
    %5 = vector.load %arg2[%c1, %c0_5] : memref<8x128xf32, #tpu.memory_space<vmem>>, vector<1x128xf32>
    %cst_6 = arith.constant dense<0.000000e+00> : vector<128xf32>
    %6 = vector.multi_reduction <add>, %3, %cst_6 [0] : vector<8x128xf32> to vector<128xf32>
    %7 = vector.shape_cast %6 : vector<128xf32> to vector<1x128xf32>
    %cst_7 = arith.constant 8.000000e+00 : f32
    %8 = vector.broadcast %cst_7 : f32 to vector<1x128xf32>
    %9 = arith.divf %7, %8 : vector<1x128xf32>
    %10 = arith.mulf %3, %3 : vector<8x128xf32>
    %cst_8 = arith.constant dense<0.000000e+00> : vector<128xf32>
    %11 = vector.multi_reduction <add>, %10, %cst_8 [0] : vector<8x128xf32> to vector<128xf32>
    %12 = vector.shape_cast %11 : vector<128xf32> to vector<1x128xf32>
    %cst_9 = arith.constant 8.000000e+00 : f32
    %13 = vector.broadcast %cst_9 : f32 to vector<1x128xf32>
    %14 = arith.divf %12, %13 : vector<1x128xf32>
    %15 = arith.mulf %9, %9 : vector<1x128xf32>
    %16 = arith.subf %14, %15 : vector<1x128xf32>
    %cst_10 = arith.constant 0.000000e+00 : f32
    %17 = vector.broadcast %cst_10 : f32 to vector<1x128xf32>
    %18 = arith.maximumf %16, %17 : vector<1x128xf32>
    %cst_11 = arith.constant 9.99999974E-6 : f32
    %19 = vector.broadcast %cst_11 : f32 to vector<1x128xf32>
    %20 = arith.addf %18, %19 : vector<1x128xf32>
    %21 = math.rsqrt %20 : vector<1x128xf32>
    %22 = arith.mulf %4, %21 : vector<1x128xf32>
    %23 = arith.mulf %9, %22 : vector<1x128xf32>
    %24 = arith.subf %5, %23 : vector<1x128xf32>
    %25 = vector.broadcast %22 : vector<1x128xf32> to vector<8x128xf32>
    %26 = arith.mulf %3, %25 : vector<8x128xf32>
    %27 = vector.broadcast %24 : vector<1x128xf32> to vector<8x128xf32>
    %28 = arith.addf %26, %27 : vector<8x128xf32>
    %cst_12 = arith.constant 0.000000e+00 : f32
    %29 = vector.broadcast %cst_12 : f32 to vector<8x128xf32>
    %30 = arith.maximumf %28, %29 : vector<8x128xf32>
    %31 = arith.truncf %30 : vector<8x128xf32> to vector<8x128xbf16>
    %c0_13 = arith.constant 0 : index
    %c128 = arith.constant 128 : index
    %32 = vector.load %arg1[%c0_13, %c128] : memref<128x384xbf16, #tpu.memory_space<vmem>>, vector<128x128xbf16>
    %cst_14 = arith.constant dense<0.000000e+00> : vector<8x128xf32>
    %33 = tpu.matmul %31, %32, %cst_14 {dimension_numbers = #tpu.dot_dimension_numbers<[1], [0], [0], [1], [0, 0, 1, 1], [], []>} : vector<8x128xbf16>, vector<128x128xbf16>, vector<8x128xf32> -> vector<8x128xf32>
    %c2 = arith.constant 2 : index
    %c0_15 = arith.constant 0 : index
    %34 = vector.load %arg2[%c2, %c0_15] : memref<8x128xf32, #tpu.memory_space<vmem>>, vector<1x128xf32>
    %c3 = arith.constant 3 : index
    %c0_16 = arith.constant 0 : index
    %35 = vector.load %arg2[%c3, %c0_16] : memref<8x128xf32, #tpu.memory_space<vmem>>, vector<1x128xf32>
    %cst_17 = arith.constant dense<0.000000e+00> : vector<128xf32>
    %36 = vector.multi_reduction <add>, %33, %cst_17 [0] : vector<8x128xf32> to vector<128xf32>
    %37 = vector.shape_cast %36 : vector<128xf32> to vector<1x128xf32>
    %cst_18 = arith.constant 8.000000e+00 : f32
    %38 = vector.broadcast %cst_18 : f32 to vector<1x128xf32>
    %39 = arith.divf %37, %38 : vector<1x128xf32>
    %40 = arith.mulf %33, %33 : vector<8x128xf32>
    %cst_19 = arith.constant dense<0.000000e+00> : vector<128xf32>
    %41 = vector.multi_reduction <add>, %40, %cst_19 [0] : vector<8x128xf32> to vector<128xf32>
    %42 = vector.shape_cast %41 : vector<128xf32> to vector<1x128xf32>
    %cst_20 = arith.constant 8.000000e+00 : f32
    %43 = vector.broadcast %cst_20 : f32 to vector<1x128xf32>
    %44 = arith.divf %42, %43 : vector<1x128xf32>
    %45 = arith.mulf %39, %39 : vector<1x128xf32>
    %46 = arith.subf %44, %45 : vector<1x128xf32>
    %cst_21 = arith.constant 0.000000e+00 : f32
    %47 = vector.broadcast %cst_21 : f32 to vector<1x128xf32>
    %48 = arith.maximumf %46, %47 : vector<1x128xf32>
    %cst_22 = arith.constant 9.99999974E-6 : f32
    %49 = vector.broadcast %cst_22 : f32 to vector<1x128xf32>
    %50 = arith.addf %48, %49 : vector<1x128xf32>
    %51 = math.rsqrt %50 : vector<1x128xf32>
    %52 = arith.mulf %34, %51 : vector<1x128xf32>
    %53 = arith.mulf %39, %52 : vector<1x128xf32>
    %54 = arith.subf %35, %53 : vector<1x128xf32>
    %55 = vector.broadcast %52 : vector<1x128xf32> to vector<8x128xf32>
    %56 = arith.mulf %33, %55 : vector<8x128xf32>
    %57 = vector.broadcast %54 : vector<1x128xf32> to vector<8x128xf32>
    %58 = arith.addf %56, %57 : vector<8x128xf32>
    %cst_23 = arith.constant 0.000000e+00 : f32
    %59 = vector.broadcast %cst_23 : f32 to vector<8x128xf32>
    %60 = arith.maximumf %58, %59 : vector<8x128xf32>
    %61 = arith.truncf %60 : vector<8x128xf32> to vector<8x128xbf16>
    %c0_24 = arith.constant 0 : index
    %c256 = arith.constant 256 : index
    %62 = vector.load %arg1[%c0_24, %c256] : memref<128x384xbf16, #tpu.memory_space<vmem>>, vector<128x128xbf16>
    %cst_25 = arith.constant dense<0.000000e+00> : vector<8x128xf32>
    %63 = tpu.matmul %61, %62, %cst_25 {dimension_numbers = #tpu.dot_dimension_numbers<[1], [0], [0], [1], [0, 0, 1, 1], [], []>} : vector<8x128xbf16>, vector<128x128xbf16>, vector<8x128xf32> -> vector<8x128xf32>
    %c4 = arith.constant 4 : index
    %c0_26 = arith.constant 0 : index
    %64 = vector.load %arg2[%c4, %c0_26] : memref<8x128xf32, #tpu.memory_space<vmem>>, vector<1x128xf32>
    %65 = vector.broadcast %64 : vector<1x128xf32> to vector<8x128xf32>
    %66 = arith.addf %63, %65 : vector<8x128xf32>
    %c0_27 = arith.constant 0 : index
    %c0_28 = arith.constant 0 : index
    %67 = vector.load %arg3[%c0_27, %c0_28] : memref<8x128xf32, #tpu.memory_space<vmem>>, vector<8x128xf32>
    tpu.vector_store %arg3[%c0_27, %c0_28], %66 {strides = array<i32>} : memref<8x128xf32, #tpu.memory_space<vmem>>, vector<8x128xf32>,
    return
  }
}

</mosaic_0001>

<bundles_post_ra>
// kernel: tpu_custom_call.1
= control target key start
LH: loop header
LB: loop body
LE: loop exit
PB: predicated region body
PF: predicated region fallthrough
CT: control target
= control target key end

     0   :  { %8 = vsyncpa [#allocation3], 0  ;;  %s736_s0 = inlined_call_operand.hbm [shape: f32[8,32], index: 0, kind: input, shape index: {}]   ;;  %s737_s1 = inlined_call_operand.hbm [shape: bf16[128,384], index: 1, kind: input, shape index: {}]   ;;  %s738_s2 = inlined_call_operand.hbm [shape: f32[8,128], index: 2, kind: input, shape index: {}]   ;;  %s739_s3 = inlined_call_operand.hbm [shape: f32[8,128], index: 3, kind: output, shape index: {}]  }
   0x1   :  { %9 = vsyncpa [#allocation6], 0 }
   0x2   :  { %10 = vsyncpa [#allocation4], 0  ;;  %s633_s12 = smov [#allocation5]   ;;  %s539_s16 = scalar_lea.hbm %s737_s1, 3072 }
   0x3   :  { %s26_s13 = sshll.u32 %s633_s12, 4  ;;  %p540_p0 = scmp.ne.s32.totalorder %s737_s1, %s539_s16  ;;  %s27_s13 = int_to_ptr.vmem [resolvable:$true] %s26_s13 }
   0x4   :  { %p543_p1 = scmp.lt.u32.totalorder %s539_s16, %s737_s1 }
   0x6   :  { %p545_p2 = pnand %p543_p1, %p540_p0 }
   0x8   :  { %548 = shalt.err (!%p545_p2)
}
   0x9   :  { %s549_s21 = scalar_lea.vmem %s27_s13, 3072  ;;  %p554_p4 = scmp.lt.s32.totalorder %s27_s13, %s27_s13 }
   0xa   :  { %p550_p3 = scmp.ne.s32.totalorder %s27_s13, %s549_s21  ;;  %p555_p5 = scmp.lt.s32.totalorder %s549_s21, %s549_s21 }
   0xc   :  { %p556_p6 = por %p555_p5, %p554_p4 }
   0xe   :  { %p557_p7 = pnand %p556_p6, %p550_p3 }
  0x10   :  { %560 = shalt.err (!%p557_p7)
}
  0x11   :  { %s634_s22 = smov 192   ;;  %s635_s23 = smov 12  }
  0x12   :  { %32 = dma.hbm_to_vmem [thread:$0]  %s737_s1, 3072, %s27_s13, [#allocation6], %s634_s22, %s634_s22, %s635_s23  }
  0x13   :  { %s636_s26 = smov [#allocation2]   ;;  %s637_s28 = smov [#allocation7]  }
  0x14   :  { %s17_s27 = sshll.u32 %s636_s26, 4  ;;  %s39_s29 = sshll.u32 %s637_s28, 4  ;;  %s18_s27 = int_to_ptr.vmem [resolvable:$true] %s17_s27  ;;  %s40_s29 = int_to_ptr.vmem [resolvable:$true] %s39_s29 }
  0x15   :  { %s561_s5 = scalar_lea.hbm %s736_s0, 128 }
  0x16   :  { %p562_p8 = scmp.ne.s32.totalorder %s736_s0, %s561_s5  ;;  %p565_p9 = scmp.lt.u32.totalorder %s561_s5, %s736_s0 }
  0x18   :  { %p567_p10 = pnand %p565_p9, %p562_p8 }
  0x1a   :  { %570 = shalt.err (!%p567_p10)
}
  0x1b   :  { %s571_s1 = scalar_lea.vmem %s18_s27, 128  ;;  %p576_p12 = scmp.lt.s32.totalorder %s18_s27, %s18_s27 }
  0x1c   :  { %p572_p11 = scmp.ne.s32.totalorder %s18_s27, %s571_s1  ;;  %p577_p13 = scmp.lt.s32.totalorder %s571_s1, %s571_s1 }
  0x1e   :  { %p578_p0 = por %p577_p13, %p576_p12 }
  0x20   :  { %p579_p1 = pnand %p578_p0, %p572_p11 }
  0x22   :  { %582 = shalt.err (!%p579_p1)
}
  0x23   :  { %20 = dma.hbm_to_vmem [thread:$0]  %s736_s0, 128, %s18_s27, [#allocation3]  }
  0x24   :  { %s583_s14 = scalar_lea.hbm %s738_s2, 128 }
  0x25   :  { %p584_p2 = scmp.ne.s32.totalorder %s738_s2, %s583_s14  ;;  %p587_p3 = scmp.lt.u32.totalorder %s583_s14, %s738_s2 }
  0x27   :  { %p589_p4 = pnand %p587_p3, %p584_p2 }
  0x29   :  { %592 = shalt.err (!%p589_p4)
}
  0x2a   :  { %s593_s19 = scalar_lea.vmem %s40_s29, 128  ;;  %p598_p6 = scmp.lt.s32.totalorder %s40_s29, %s40_s29 }
  0x2b   :  { %p594_p5 = scmp.ne.s32.totalorder %s40_s29, %s593_s19  ;;  %p599_p7 = scmp.lt.s32.totalorder %s593_s19, %s593_s19 }
  0x2d   :  { %p600_p8 = por %p599_p7, %p598_p6 }
  0x2f   :  { %p601_p9 = pnand %p600_p8, %p594_p5 }
  0x31   :  { %604 = shalt.err (!%p601_p9)
}
  0x32   :  { %42 = dma.hbm_to_vmem [thread:$0]  %s738_s2, 128, %s40_s29, [#allocation6]  }
  0x33   :  { %627 = dma.done.wait [#allocation3], 128  }
  0x34   :  { %628 = vsyncadd [#allocation3], 4294967168 }
  0x35   :  { %629 = dma.done.wait [#allocation6], 3200  }
  0x36   :  { %630 = vsyncadd [#allocation6], 4294964096  ;;  %v638_v0 = vmov 0.0   ;;  %vm639_vm0 = vmmov 0   ;;  %v517_v1 = vld [vmem:[#allocation5] ss:$12 sps:$4 sm:$0xff]   ;;  %v141_v36 = vlaneseq }
  0x37   :  { %461 = vmatprep.subr.bf16.mxu0 %v638_v0  ;;  %465 = vmatprep.mubr.msk.bf16.mxu0 %vm639_vm0, %v638_v0  ;;  %v518_v2 = vld [vmem:[#allocation5 + $0x18] ss:$12 sps:$4 sm:$0xff]   ;;  %vm71_vm1 = vcmask 261120   ;;  %v520_v6 = vld [vmem:[#allocation5 + $0x1c] ss:$12 sps:$4 sm:$0xff]   ;;  %s640_s2 = smov [#allocation8]  }
  0x38   :  { %469 = vmatprep.subr.bf16.mxu1 %v638_v0  ;;  %485 = vmatprep.mubr.msk.bf16.mxu1 %vm639_vm0, %v638_v0  ;;  %v53_v3 = vld [vmem:[#allocation2] sm:$0xff]  ;;  %v519_v5 = vld [vmem:[#allocation5 + $0x4] ss:$12 sps:$4 sm:$0xff]   ;;  %v521_v7 = vld [vmem:[#allocation5 + $0x34] ss:$12 sps:$4 sm:$0xff]   ;;  %v142_v37 = vshrl.u32 %v141_v36, 7 }
  0x39   :  { %462 = vmatpush3.bf16.msra.mxu0 %v517_v1  ;;  %v54_v4 = vpack.c.bf16 %v53_v3, %v53_v3  ;;  %470 = vmatpush3.bf16.msra.mxu1 %v519_v5  ;;  %v522_v8 = vld [vmem:[#allocation5 + $0x4c] ss:$12 sps:$4 sm:$0xff]   ;;  %v523_v9 = vld [vmem:[#allocation5 + $0x64] ss:$12 sps:$4 sm:$0xff]   ;;  %v524_v10 = vld [vmem:[#allocation5 + $0x7c] ss:$12 sps:$4 sm:$0xff]  }
  0x3a   :  { %463 = vmatprep.subr.bf16.mxu0 %v638_v0  ;;  %471 = vmatprep.subr.bf16.mxu1 %v638_v0  ;;  %v525_v11 = vld [vmem:[#allocation5 + $0x94] ss:$12 sps:$4 sm:$0xff]   ;;  %v526_v12 = vld [vmem:[#allocation5 + $0xac] ss:$12 sps:$4 sm:$0xff]   ;;  %v711_v39 = vsub.s32 0, %v142_v37  ;;  %s410_s21 = sshll.u32 %s640_s2, 4  ;;  %s411_s21 = int_to_ptr.vmem [resolvable:$true] %s410_s21 }
  0x3b   :  { %v115_v38 = vld [vmem:[#allocation7] sm:$0x1]  ;;  %v116_v42 = vld [vmem:[#allocation7 + $0x1] sm:$0x1]  ;;  %v527_v51 = vld [vmem:[#allocation5 + $0x8] ss:$12 sps:$4 sm:$0xff]   ;;  %p610_p11 = scmp.lt.s32.totalorder %s411_s21, %s411_s21 }
  0x3c   :  { %v528_v52 = vld [vmem:[#allocation5 + $0x20] ss:$12 sps:$4 sm:$0xff]   ;;  %v529_v53 = vld [vmem:[#allocation5 + $0x38] ss:$12 sps:$4 sm:$0xff]   ;;  %v530_v54 = vld [vmem:[#allocation5 + $0x50] ss:$12 sps:$4 sm:$0xff]  }
  0x3d   :  { %464 = vmatpush3.bf16.msra.mxu0 %v518_v2  ;;  %472 = vmatpush3.bf16.msra.mxu1 %v520_v6  ;;  %v531_v55 = vld [vmem:[#allocation5 + $0x68] ss:$12 sps:$4 sm:$0xff]   ;;  %v532_v56 = vld [vmem:[#allocation5 + $0x80] ss:$12 sps:$4 sm:$0xff]   ;;  %v533_v57 = vld [vmem:[#allocation5 + $0x98] ss:$12 sps:$4 sm:$0xff]  }
  0x3e   :  { %489 = vmatprep.subr.bf16.mxu0 %v638_v0  ;;  %473 = vmatprep.subr.bf16.mxu1 %v638_v0  ;;  %v534_v58 = vld [vmem:[#allocation5 + $0xb0] ss:$12 sps:$4 sm:$0xff]   ;;  %s605_s22 = scalar_lea.vmem %s411_s21, 128 }
  0x3f   :  { %p606_p10 = scmp.ne.s32.totalorder %s411_s21, %s605_s22  ;;  %p611_p12 = scmp.lt.s32.totalorder %s605_s22, %s605_s22 }
  0x40   :  { %466 = vmatmul.mubr.msk.bf16.vlgmr.msra.gmra.mrb[0].mxu0 %vm71_vm1, %v54_v4 }
  0x41   :  { %505 = vmatprep.mubr.msk.bf16.mxu0 %vm639_vm0, %v638_v0  ;;  %474 = vmatpush3.bf16.msra.mxu1 %v521_v7  ;;  %p612_p13 = por %p611_p12, %p610_p11 }
  0x42   :  { %475 = vmatprep.subr.bf16.mxu1 %v638_v0  ;;  %490 = vmatpush3.bf16.msra.mxu0 %v527_v51 }
  0x43   :  { %491 = vmatprep.subr.bf16.mxu0 %v638_v0  ;;  %p613_p0 = pnand %p612_p13, %p606_p10 }
  0x45   :  { %476 = vmatpush3.bf16.msra.mxu1 %v522_v8 }
  0x46   :  { %477 = vmatprep.subr.bf16.mxu1 %v638_v0  ;;  %492 = vmatpush3.bf16.msra.mxu0 %v528_v52 }
  0x47   :  { %493 = vmatprep.subr.bf16.mxu0 %v638_v0 }
  0x49   :  { %478 = vmatpush3.bf16.msra.mxu1 %v523_v9 }
  0x4a   :  { %479 = vmatprep.subr.bf16.mxu1 %v638_v0  ;;  %494 = vmatpush3.bf16.msra.mxu0 %v529_v53 }
  0x4b   :  { %495 = vmatprep.subr.bf16.mxu0 %v638_v0 }
  0x4d   :  { %480 = vmatpush3.bf16.msra.mxu1 %v524_v10 }
  0x4e   :  { %481 = vmatprep.subr.bf16.mxu1 %v638_v0  ;;  %496 = vmatpush3.bf16.msra.mxu0 %v530_v54 }
  0x4f   :  { %497 = vmatprep.subr.bf16.mxu0 %v638_v0 }
  0x51   :  { %482 = vmatpush3.bf16.msra.mxu1 %v525_v11 }
  0x52   :  { %483 = vmatprep.subr.bf16.mxu1 %v638_v0  ;;  %498 = vmatpush3.bf16.msra.mxu0 %v531_v55 }
  0x53   :  { %499 = vmatprep.subr.bf16.mxu0 %v638_v0 }
  0x55   :  { %484 = vmatpush3.bf16.msra.mxu1 %v526_v12 }
  0x56   :  { %500 = vmatpush3.bf16.msra.mxu0 %v532_v56 }
  0x57   :  { %501 = vmatprep.subr.bf16.mxu0 %v638_v0 }
  0x5a   :  { %502 = vmatpush3.bf16.msra.mxu0 %v533_v57 }
  0x5b   :  { %503 = vmatprep.subr.bf16.mxu0 %v638_v0 }
  0x5e   :  { %504 = vmatpush3.bf16.msra.mxu0 %v534_v58 }
 0x113   :  { %v109_v13 = vpop.f32.mrb[0].mxu0 }
 0x114   :  { %v117_v14 = vrot.slane %v109_v13, 4  ;;  %v125_v15 = vmul.f32 %v109_v13, %v109_v13  ;;  %v467_v16 = vpop.f32.mrb[1].mxu0 }
 0x115   :  { %v112_v17 = vpop.f32.mrb[2].mxu0 }
 0x116   :  { %v118_v18 = vadd.f32 %v117_v14, %v109_v13  ;;  %v126_v19 = vrot.slane %v125_v15, 4  ;;  %v468_v20 = vpop.f32.mrb[3].mxu0 }
 0x118   :  { %v119_v21 = vrot.slane %v118_v18, 2  ;;  %v127_v22 = vadd.f32 %v126_v19, %v125_v15 }
 0x11a   :  { %v120_v23 = vadd.f32 %v119_v21, %v118_v18  ;;  %v128_v24 = vrot.slane %v127_v22, 2  ;;  %v257_v18 = vld [vmem:[#allocation7 + $0x2] sm:$0x1]  ;;  %v258_v21 = vld [vmem:[#allocation7 + $0x3] sm:$0x1] }
 0x11c   :  { %v121_v25 = vrot.slane %v120_v23, 1  ;;  %v129_v26 = vadd.f32 %v128_v24, %v127_v22 }
 0x11e   :  { %v122_v27 = vadd.f32 %v121_v25, %v120_v23  ;;  %v130_v28 = vrot.slane %v129_v26, 1 }
 0x120   :  { %v124_v29 = vmul.f32 0.125, %v122_v27  ;;  %v131_v30 = vadd.f32 %v130_v28, %v129_v26 }
 0x122   :  { %v132_v31 = vmul.f32 0.125, %v131_v30  ;;  %v133_v32 = vmul.f32 %v124_v29, %v124_v29  ;;  %v431_v30 = vld [vmem:[#allocation7 + $0x4] ss:$0 sm:$0xff] }
 0x124   :  { %v134_v33 = vsub.f32 %v132_v31, %v133_v32 }
 0x126   :  { %v135_v34 = vmax.f32 %v134_v33, 0.0 }
 0x128   :  { %v136_v35 = vadd.f32 1e-05, %v135_v34 }
 0x12a   :  { %535 = vrsqrt.f32 %v136_v35 }
 0x134   :  { %v536_v40 = vpop.eup %535 }
 0x135   :  { %v138_v41 = vmul.f32 %v536_v40, %v115_v38 }
 0x137   :  { %v144_v43 = vrot.slane %v138_v41, %v711_v39  ;;  %v139_v44 = vmul.f32 %v138_v41, %v124_v29 }
 0x139   :  { %v140_v45 = vsub.f32 %v116_v42, %v139_v44  ;;  %v145_v46 = vmul.f32 %v144_v43, %v109_v13 }
 0x13b   :  { %v149_v47 = vrot.slane %v140_v45, %v711_v39 }
 0x13d   :  { %v150_v48 = vadd.f32 %v149_v47, %v145_v46 }
 0x13f   :  { %v151_v49 = vmax.f32 %v150_v48, 0.0 }
 0x141   :  { %v152_v50 = vpack.c.bf16 %v151_v49, %v151_v49 }
 0x143   :  { %486 = vmatmul.mubr.bf16.vlgmr.msra.gmra.mrb[0].mxu1 %v152_v50 }
 0x216   :  { %v251_v59 = vpop.f32.mrb[0].mxu1 }
 0x217   :  { %v259_v60 = vrot.slane %v251_v59, 4  ;;  %v266_v61 = vmul.f32 %v251_v59, %v251_v59  ;;  %v487_v62 = vpop.f32.mrb[1].mxu1 }
 0x218   :  { %v254_v63 = vpop.f32.mrb[2].mxu1 }
 0x219   :  { %v260_v1 = vadd.f32 %v259_v60, %v251_v59  ;;  %v267_v2 = vrot.slane %v266_v61, 4  ;;  %v488_v3 = vpop.f32.mrb[3].mxu1 }
 0x21b   :  { %v261_v4 = vrot.slane %v260_v1, 2  ;;  %v268_v5 = vadd.f32 %v267_v2, %v266_v61 }
 0x21d   :  { %v262_v6 = vadd.f32 %v261_v4, %v260_v1  ;;  %v269_v7 = vrot.slane %v268_v5, 2 }
 0x21f   :  { %v263_v8 = vrot.slane %v262_v6, 1  ;;  %v270_v9 = vadd.f32 %v269_v7, %v268_v5 }
 0x221   :  { %v264_v10 = vadd.f32 %v263_v8, %v262_v6  ;;  %v271_v11 = vrot.slane %v270_v9, 1 }
 0x223   :  { %v265_v12 = vmul.f32 0.125, %v264_v10  ;;  %v272_v0 = vadd.f32 %v271_v11, %v270_v9 }
 0x225   :  { %v273_v13 = vmul.f32 0.125, %v272_v0  ;;  %v274_v14 = vmul.f32 %v265_v12, %v265_v12 }
 0x227   :  { %v275_v15 = vsub.f32 %v273_v13, %v274_v14 }
 0x229   :  { %v276_v16 = vmax.f32 %v275_v15, 0.0 }
 0x22b   :  { %v277_v17 = vadd.f32 1e-05, %v276_v16 }
 0x22d   :  { %537 = vrsqrt.f32 %v277_v17 }
 0x237   :  { %v538_v19 = vpop.eup %537 }
 0x238   :  { %v279_v20 = vmul.f32 %v538_v19, %v257_v18 }
 0x23a   :  { %v280_v22 = vmul.f32 %v279_v20, %v265_v12  ;;  %v285_v23 = vrot.slane %v279_v20, %v711_v39 }
 0x23c   :  { %v281_v24 = vsub.f32 %v258_v21, %v280_v22  ;;  %v286_v25 = vmul.f32 %v285_v23, %v251_v59 }
 0x23e   :  { %v290_v26 = vrot.slane %v281_v24, %v711_v39 }
 0x240   :  { %v291_v27 = vadd.f32 %v290_v26, %v286_v25 }
 0x242   :  { %v292_v28 = vmax.f32 %v291_v27, 0.0 }
 0x244   :  { %v293_v29 = vpack.c.bf16 %v292_v28, %v292_v28 }
 0x246   :  { %506 = vmatmul.mubr.bf16.vlgmr.msra.gmra.mrb[4].mxu0 %v293_v29 }
 0x319   :  { %v397_v31 = vpop.f32.mrb[4].mxu0 }
 0x31a   :  { %v398_v32 = vadd.f32 %v431_v30, %v397_v31  ;;  %v507_v33 = vpop.f32.mrb[5].mxu0 }
 0x31b   :  { %v400_v34 = vpop.f32.mrb[6].mxu0 }
 0x31c   :  { %403 = vst [vmem:[#allocation8] sm:$0xff] %v398_v32  ;;  %v508_v35 = vpop.f32.mrb[7].mxu0 }
 0x31d   :  { %616 = shalt.err (!%p613_p0)
}
 0x31e   :  { %s617_s25 = scalar_lea.hbm %s739_s3, 128 }
 0x31f   :  { %p618_p1 = scmp.ne.s32.totalorder %s739_s3, %s617_s25  ;;  %p621_p2 = scmp.lt.u32.totalorder %s617_s25, %s739_s3 }
 0x321   :  { %p623_p3 = pnand %p621_p2, %p618_p1 }
 0x323   :  { %626 = shalt.err (!%p623_p3)
}
 0x324   :  { %413 = dma.vmem_to_hbm [thread:$0]  %s411_s21, 128, %s739_s3, [#allocation4]  }
 0x325   :  { %631 = dma.done.wait [#allocation4], 128  }
 0x326   :  { %632 = vsyncadd [#allocation4], 4294967168 }
 0x327   :  { %417 = vsyncpa [#allocation3], 1 }
 0x328   :  { %418 = vsyncpa [#allocation6], 1 }
 0x329   :  { %419 = vsyncpa [#allocation4], 1 }

</bundles_post_ra>
